<compile_context>
chip_gen: v5e
topology: v5e:2x2
jax: 0.10.0
libtpu: 0.0.40
codegen_flags: <defaults>
</compile_context>

<pallas_src>
import functools

import jax
import jax.numpy as jnp
from jax.experimental import pallas as pl
from jax.experimental.pallas import tpu as pltpu

LANE = 128      # vreg lane width  (last dim)
SUBLANE = 8     # vreg sublane width (second-to-last dim)


def _round_up(n: int, m: int) -> int:
    return ((n + m - 1) // m) * m


def _cdiv(a: int, b: int) -> int:
    return (a + b - 1) // b


# ----------------------------------------------------------------------------
# Kernel: fused (Linear + ReLU) x n_layers.  refs = (w0, b0, ..., w_{L-1},
# b_{L-1}, o_ref).  Intermediates stay in vregs/VMEM; only the final
# activation is stored (lane-dense).
# ----------------------------------------------------------------------------
def _mlp_kernel(n_layers, x_ref, *refs):
    o_ref = refs[-1]
    h = x_ref[...]
    for i in range(n_layers):
        w = refs[2 * i][...]
        b = refs[2 * i + 1][...]              # (1, pout) -> broadcasts over rows
        if h.dtype != w.dtype:
            h = h.astype(w.dtype)             # bf16 MXU operands (weights pre-cast)
        h = jnp.dot(h, w, preferred_element_type=jnp.float32)
        h = jnp.maximum(h + b.astype(jnp.float32), 0.0)
        if i + 1 < n_layers and h.dtype != w.dtype:
            h = h.astype(w.dtype)             # narrow the inter-layer activation
    o_ref[...] = h.astype(o_ref.dtype)


# ----------------------------------------------------------------------------
# Parameter initialisation (mimics nn.Linear's U(-1/sqrt(fan_in), ...)) and
# one-time preparation (lane padding + compute-dtype cast), done OUTSIDE the
# per-step forward.
# ----------------------------------------------------------------------------
def init_shared_network_params(key, obs_dim, hidden_dims, dtype=jnp.float32):
    """Weights stored pre-transposed as [in_features, out_features]."""
    params = []
    curr = obs_dim
    for dim in hidden_dims:
        key, kw, kb = jax.random.split(key, 3)
        bound = 1.0 / float(curr) ** 0.5
        w = jax.random.uniform(kw, (curr, dim), dtype=dtype, minval=-bound, maxval=bound)
        b = jax.random.uniform(kb, (dim,), dtype=dtype, minval=-bound, maxval=bound)
        params.append((w, b))
        curr = dim
    return params


def prepare_params(params, compute_dtype=jnp.bfloat16):
    """Pad output feature dims to 128 lanes and cast weights to compute dtype.

    Runs ONCE.  Returns (flat_params, out_dim):
      flat_params = (w0, b0, w1, b1, ...) with
        w_i : [in_i_padded, round_up(out_i, 128)]  (layer-0 K dim left unpadded)
        b_i : [1,           round_up(out_i, 128)]  (kept float32 for accuracy)
      out_dim = true (unpadded) output width of the last layer.
    Zero padding keeps the math exact: padded lanes see zero weights/bias and
    relu(0) = 0 feeds zeros onward; the wrapper slices them off.
    """
    flat = []
    prev_pad = None
    for li, (w, b) in enumerate(params):
        din, dout = w.shape
        pin = din if li == 0 else prev_pad
        pout = _round_up(dout, LANE)
        wp = jnp.zeros((pin, pout), dtype=compute_dtype)
        wp = wp.at[:din, :dout].set(w.astype(compute_dtype))
        bp = jnp.zeros((1, pout), dtype=jnp.float32)
        bp = bp.at[0, :dout].set(b.astype(jnp.float32))
        flat += [wp, bp]
        prev_pad = pout
    out_dim = params[-1][0].shape[1]
    return tuple(flat), out_dim


# ----------------------------------------------------------------------------
# VMEM budget derived from the actual footprint, clamped to device capacity.
# ----------------------------------------------------------------------------
def _device_vmem_cap():
    try:
        info_fn = getattr(pltpu, "get_tpu_info", None)
        if info_fn is None:
            return None
        info = info_fn()
        for name in ("vmem_capacity_bytes", "vmem_bytes", "vmem_size_bytes"):
            cap = getattr(info, name, None)
            if cap:
                return int(cap)
    except Exception:
        pass
    return None


def _vmem_budget(tile, obs_dim, pdims, flat_params, x_itemsize, single_buffer_weights):
    wbuf = 1 if single_buffer_weights else 2
    weight_bytes = sum(int(p.size) * p.dtype.itemsize for p in flat_params) * wbuf
    stream_bytes = 2 * tile * (obs_dim + pdims[-1]) * x_itemsize      # x + out, 2-deep
    act_bytes = 2 * tile * max(pdims) * 4                             # f32 temporaries
    need = weight_bytes + stream_bytes + act_bytes + (4 << 20)        # headroom
    lo, hi = 32 << 20, 100 << 20
    cap = _device_vmem_cap()
    if cap:                                   # e.g. 64 MiB/TC on v7x, 128 MiB v5e/v6e
        hi = min(hi, (cap * 3) // 4)
    return int(min(max(need, lo), hi))


# ----------------------------------------------------------------------------
# Forward pass: one fused pallas_call.
# ----------------------------------------------------------------------------
@functools.partial(
    jax.jit,
    static_argnames=("out_dim", "block_batch", "min_grid_steps", "single_buffer_weights"),
)
def shared_network_forward(x, flat_params, *, out_dim, block_batch=1024,
                           min_grid_steps=2, single_buffer_weights=True):
    batch, obs_dim = x.shape
    n_layers = len(flat_params) // 2
    weights = flat_params[0::2]
    assert weights[0].shape[0] == obs_dim, "x feature dim != first layer fan-in"
    pdims = [obs_dim] + [int(w.shape[1]) for w in weights]

    # Batch tiling: bound padding waste and keep >= min_grid_steps grid steps
    # (so the "parallel" axis spans both TensorCores on v7x).
    n_target = max(_cdiv(batch, block_batch), min_grid_steps)
    tile = max(SUBLANE, _round_up(_cdiv(batch, n_target), SUBLANE))
    n_tiles = _cdiv(batch, tile)
    pbatch = n_tiles * tile
    if pbatch != batch:
        x = jnp.pad(x, ((0, pbatch - batch), (0, 0)))

    # Constant index_map -> weights/biases fetched once, resident across the
    # batch grid.  Single-buffer them (no point double-buffering a block whose
    # index never changes); only x / out stream through the pipeline.
    wmode = dict(pipeline_mode=pl.Buffered(1)) if single_buffer_weights else {}

    in_specs = [pl.BlockSpec((tile, obs_dim), lambda i: (i, 0))]
    for li in range(n_layers):
        pin, pout = pdims[li], pdims[li + 1]
        in_specs += [
            pl.BlockSpec((pin, pout), lambda i: (0, 0), **wmode),
            pl.BlockSpec((1, pout), lambda i: (0, 0), **wmode),
        ]

    vmem_limit = _vmem_budget(tile, obs_dim, pdims, flat_params,
                              x.dtype.itemsize, single_buffer_weights)

    out_padded = pl.pallas_call(
        functools.partial(_mlp_kernel, n_layers),
        out_shape=jax.ShapeDtypeStruct((pbatch, pdims[-1]), x.dtype),
        grid=(n_tiles,),
        in_specs=in_specs,
        out_specs=pl.BlockSpec((tile, pdims[-1]), lambda i: (i, 0)),
        compiler_params=pltpu.CompilerParams(
            dimension_semantics=("parallel",),   # shards across v7x's 2 TCs
            vmem_limit_bytes=vmem_limit,
        ),
    )(x, *flat_params)

    if pbatch == batch and pdims[-1] == out_dim:
        return out_padded
    return out_padded[:batch, :out_dim]


# Non-jitted convenience wrapper: tries the single-buffered-weights variant
# first and falls back transparently if this JAX build rejects pl.Buffered(1).
_SINGLE_BUFFER_OK = None


def shared_network_apply(x, flat_params, out_dim, **kw):
    global _SINGLE_BUFFER_OK
    if _SINGLE_BUFFER_OK is not False:
        try:
            out = shared_network_forward(x, flat_params, out_dim=out_dim,
                                         single_buffer_weights=True, **kw)
            _SINGLE_BUFFER_OK = True
            return out
        except Exception:
            if _SINGLE_BUFFER_OK is True:
                raise
            _SINGLE_BUFFER_OK = False
    return shared_network_forward(x, flat_params, out_dim=out_dim,
                                  single_buffer_weights=False, **kw)


if __name__ == "__main__":
    key = jax.random.PRNGKey(0)

    batch = 8
    obs_dim = 16
    hidden_dims = [32, 32]

    k_params, k_x, k_x2 = jax.random.split(key, 3)
    params = init_shared_network_params(k_params, obs_dim, hidden_dims)
    x = jax.random.normal(k_x, (batch, obs_dim), dtype=jnp.float32)

    # Pure-JAX reference (same math as PyTorch Sequential of Linear + ReLU).
    def ref_forward(h, ps):
        for w, b in ps:
            h = jnp.maximum(h @ w + b, 0.0)
        return h

    ref = ref_forward(x, params)

    # ---- exact-f32 path: must match the reference tightly ------------------
    fp32_params, out_dim = prepare_params(params, compute_dtype=jnp.float32)
    out = jax.block_until_ready(shared_network_apply(x, fp32_params, out_dim))
    assert out.shape == (batch, hidden_dims[-1])
    assert jnp.allclose(out, ref, atol=1e-5, rtol=1e-5), "mismatch vs reference (f32)"

    # Odd batch: exercises batch padding + multi-step ("parallel") grid.
    x2 = jax.random.normal(k_x2, (20, obs_dim), dtype=jnp.float32)
    out2 = jax.block_until_ready(shared_network_apply(x2, fp32_params, out_dim))
    ref2 = ref_forward(x2, params)
    assert out2.shape == (20, hidden_dims[-1])
    assert jnp.allclose(out2, ref2, atol=1e-5, rtol=1e-5), "mismatch (batch=20)"

    # ---- default bf16 compute path (MXU-native); looser tolerance vs f32 ---
    bf16_params, out_dim_bf = prepare_params(params)   # compute_dtype=bf16
    out_bf = jax.block_until_ready(shared_network_apply(x, bf16_params, out_dim_bf))
    assert out_bf.shape == (batch, hidden_dims[-1])
    assert jnp.allclose(out_bf, ref, atol=5e-2, rtol=5e-2), "mismatch (bf16 path)"

    print("KERNEL_OK")
</pallas_src>

<mosaic_0001>
module attributes {stable_mosaic.version = 11 : i64} {
  func.func @_mlp_kernel(%arg0: i32, %arg1: memref<8x16xf32, #tpu.memory_space<vmem>>, %arg2: memref<16x128xf32, #tpu.memory_space<vmem>>, %arg3: memref<1x128xf32, #tpu.memory_space<vmem>>, %arg4: memref<128x128xf32, #tpu.memory_space<vmem>>, %arg5: memref<1x128xf32, #tpu.memory_space<vmem>>, %arg6: memref<8x128xf32, #tpu.memory_space<vmem>>) attributes {dimension_semantics = [#tpu.dimension_semantics<parallel>], iteration_bounds = array<i64: 1>, scalar_prefetch = 0 : i64, scratch_operands = 0 : i64, tpu.core_type = #tpu.core_type<tc>, window_params = [{transform_indices = @transform_0, window_bounds = array<i64: 8, 16>}, {pipeline_mode = #tpu.pipeline_mode<synchronous>, transform_indices = @transform_1, window_bounds = array<i64: 16, 128>}, {pipeline_mode = #tpu.pipeline_mode<synchronous>, transform_indices = @transform_2, window_bounds = array<i64: 1, 128>}, {pipeline_mode = #tpu.pipeline_mode<synchronous>, transform_indices = @transform_3, window_bounds = array<i64: 128, 128>}, {pipeline_mode = #tpu.pipeline_mode<synchronous>, transform_indices = @transform_4, window_bounds = array<i64: 1, 128>}, {transform_indices = @transform_5, window_bounds = array<i64: 8, 128>}]} {
    %c0 = arith.constant 0 : index
    %c0_0 = arith.constant 0 : index
    %0 = vector.load %arg1[%c0, %c0_0] : memref<8x16xf32, #tpu.memory_space<vmem>>, vector<8x16xf32>
    %c0_1 = arith.constant 0 : index
    %c0_2 = arith.constant 0 : index
    %1 = vector.load %arg2[%c0_1, %c0_2] : memref<16x128xf32, #tpu.memory_space<vmem>>, vector<16x128xf32>
    %c0_3 = arith.constant 0 : index
    %c0_4 = arith.constant 0 : index
    %2 = vector.load %arg3[%c0_3, %c0_4] : memref<1x128xf32, #tpu.memory_space<vmem>>, vector<1x128xf32>
    %cst = arith.constant dense<0.000000e+00> : vector<8x128xf32>
    %3 = tpu.matmul %0, %1, %cst {dimension_numbers = #tpu.dot_dimension_numbers<[1], [0], [0], [1], [0, 0, 1, 1], [], []>} : vector<8x16xf32>, vector<16x128xf32>, vector<8x128xf32> -> vector<8x128xf32>
    %4 = vector.broadcast %2 : vector<1x128xf32> to vector<8x128xf32>
    %5 = arith.addf %3, %4 : vector<8x128xf32>
    %cst_5 = arith.constant 0.000000e+00 : f32
    %6 = vector.broadcast %cst_5 : f32 to vector<8x128xf32>
    %7 = arith.maximumf %5, %6 : vector<8x128xf32>
    %c0_6 = arith.constant 0 : index
    %c0_7 = arith.constant 0 : index
    %8 = vector.load %arg4[%c0_6, %c0_7] : memref<128x128xf32, #tpu.memory_space<vmem>>, vector<128x128xf32>
    %c0_8 = arith.constant 0 : index
    %c0_9 = arith.constant 0 : index
    %9 = vector.load %arg5[%c0_8, %c0_9] : memref<1x128xf32, #tpu.memory_space<vmem>>, vector<1x128xf32>
    %cst_10 = arith.constant dense<0.000000e+00> : vector<8x128xf32>
    %10 = tpu.matmul %7, %8, %cst_10 {dimension_numbers = #tpu.dot_dimension_numbers<[1], [0], [0], [1], [0, 0, 1, 1], [], []>} : vector<8x128xf32>, vector<128x128xf32>, vector<8x128xf32> -> vector<8x128xf32>
    %11 = vector.broadcast %9 : vector<1x128xf32> to vector<8x128xf32>
    %12 = arith.addf %10, %11 : vector<8x128xf32>
    %cst_11 = arith.constant 0.000000e+00 : f32
    %13 = vector.broadcast %cst_11 : f32 to vector<8x128xf32>
    %14 = arith.maximumf %12, %13 : vector<8x128xf32>
    %c0_12 = arith.constant 0 : index
    %c0_13 = arith.constant 0 : index
    %15 = vector.load %arg6[%c0_12, %c0_13] : memref<8x128xf32, #tpu.memory_space<vmem>>, vector<8x128xf32>
    tpu.vector_store %arg6[%c0_12, %c0_13], %14 {strides = array<i32>} : memref<8x128xf32, #tpu.memory_space<vmem>>, vector<8x128xf32>,
    return
  }
  func.func @transform_0(%arg0: i32) -> (i32, i32) {
    %c0_i32 = arith.constant 0 : i32
    %c0_i32_0 = arith.constant 0 : i32
    return %arg0, %c0_i32 : i32, i32
  }
  func.func @transform_1(%arg0: i32) -> (i32, i32) {
    %c0_i32 = arith.constant 0 : i32
    %c0_i32_0 = arith.constant 0 : i32
    %c0_i32_1 = arith.constant 0 : i32
    return %c0_i32, %c0_i32_0 : i32, i32
  }
  func.func @transform_2(%arg0: i32) -> (i32, i32) {
    %c0_i32 = arith.constant 0 : i32
    %c0_i32_0 = arith.constant 0 : i32
    %c0_i32_1 = arith.constant 0 : i32
    return %c0_i32, %c0_i32_0 : i32, i32
  }
  func.func @transform_3(%arg0: i32) -> (i32, i32) {
    %c0_i32 = arith.constant 0 : i32
    %c0_i32_0 = arith.constant 0 : i32
    %c0_i32_1 = arith.constant 0 : i32
    return %c0_i32, %c0_i32_0 : i32, i32
  }
  func.func @transform_4(%arg0: i32) -> (i32, i32) {
    %c0_i32 = arith.constant 0 : i32
    %c0_i32_0 = arith.constant 0 : i32
    %c0_i32_1 = arith.constant 0 : i32
    return %c0_i32, %c0_i32_0 : i32, i32
  }
  func.func @transform_5(%arg0: i32) -> (i32, i32) {
    %c0_i32 = arith.constant 0 : i32
    %c0_i32_0 = arith.constant 0 : i32
    return %arg0, %c0_i32 : i32, i32
  }
}

module attributes {stable_mosaic.version = 11 : i64} {
  func.func @_mlp_kernel(%arg0: i32, %arg1: memref<8x16xf32, #tpu.memory_space<vmem>>, %arg2: memref<16x128xf32, #tpu.memory_space<vmem>>, %arg3: memref<1x128xf32, #tpu.memory_space<vmem>>, %arg4: memref<128x128xf32, #tpu.memory_space<vmem>>, %arg5: memref<1x128xf32, #tpu.memory_space<vmem>>, %arg6: memref<8x128xf32, #tpu.memory_space<vmem>>) attributes {dimension_semantics = [#tpu.dimension_semantics<parallel>], iteration_bounds = array<i64: 1>, scalar_prefetch = 0 : i64, scratch_operands = 0 : i64, tpu.core_type = #tpu.core_type<tc>, window_params = [{transform_indices = @transform_0, window_bounds = array<i64: 8, 16>}, {pipeline_mode = #tpu.pipeline_mode<synchronous>, transform_indices = @transform_1, window_bounds = array<i64: 16, 128>}, {pipeline_mode = #tpu.pipeline_mode<synchronous>, transform_indices = @transform_2, window_bounds = array<i64: 1, 128>}, {pipeline_mode = #tpu.pipeline_mode<synchronous>, transform_indices = @transform_3, window_bounds = array<i64: 128, 128>}, {pipeline_mode = #tpu.pipeline_mode<synchronous>, transform_indices = @transform_4, window_bounds = array<i64: 1, 128>}, {transform_indices = @transform_5, window_bounds = array<i64: 8, 128>}]} {
    %c0 = arith.constant 0 : index
    %c0_0 = arith.constant 0 : index
    %0 = vector.load %arg1[%c0, %c0_0] : memref<8x16xf32, #tpu.memory_space<vmem>>, vector<8x16xf32>
    %c0_1 = arith.constant 0 : index
    %c0_2 = arith.constant 0 : index
    %1 = vector.load %arg2[%c0_1, %c0_2] : memref<16x128xf32, #tpu.memory_space<vmem>>, vector<16x128xf32>
    %c0_3 = arith.constant 0 : index
    %c0_4 = arith.constant 0 : index
    %2 = vector.load %arg3[%c0_3, %c0_4] : memref<1x128xf32, #tpu.memory_space<vmem>>, vector<1x128xf32>
    %cst = arith.constant dense<0.000000e+00> : vector<8x128xf32>
    %3 = tpu.matmul %0, %1, %cst {dimension_numbers = #tpu.dot_dimension_numbers<[1], [0], [0], [1], [0, 0, 1, 1], [], []>} : vector<8x16xf32>, vector<16x128xf32>, vector<8x128xf32> -> vector<8x128xf32>
    %4 = vector.broadcast %2 : vector<1x128xf32> to vector<8x128xf32>
    %5 = arith.addf %3, %4 : vector<8x128xf32>
    %cst_5 = arith.constant 0.000000e+00 : f32
    %6 = vector.broadcast %cst_5 : f32 to vector<8x128xf32>
    %7 = arith.maximumf %5, %6 : vector<8x128xf32>
    %c0_6 = arith.constant 0 : index
    %c0_7 = arith.constant 0 : index
    %8 = vector.load %arg4[%c0_6, %c0_7] : memref<128x128xf32, #tpu.memory_space<vmem>>, vector<128x128xf32>
    %c0_8 = arith.constant 0 : index
    %c0_9 = arith.constant 0 : index
    %9 = vector.load %arg5[%c0_8, %c0_9] : memref<1x128xf32, #tpu.memory_space<vmem>>, vector<1x128xf32>
    %cst_10 = arith.constant dense<0.000000e+00> : vector<8x128xf32>
    %10 = tpu.matmul %7, %8, %cst_10 {dimension_numbers = #tpu.dot_dimension_numbers<[1], [0], [0], [1], [0, 0, 1, 1], [], []>} : vector<8x128xf32>, vector<128x128xf32>, vector<8x128xf32> -> vector<8x128xf32>
    %11 = vector.broadcast %9 : vector<1x128xf32> to vector<8x128xf32>
    %12 = arith.addf %10, %11 : vector<8x128xf32>
    %cst_11 = arith.constant 0.000000e+00 : f32
    %13 = vector.broadcast %cst_11 : f32 to vector<8x128xf32>
    %14 = arith.maximumf %12, %13 : vector<8x128xf32>
    %c0_12 = arith.constant 0 : index
    %c0_13 = arith.constant 0 : index
    %15 = vector.load %arg6[%c0_12, %c0_13] : memref<8x128xf32, #tpu.memory_space<vmem>>, vector<8x128xf32>
    tpu.vector_store %arg6[%c0_12, %c0_13], %14 {strides = array<i32>} : memref<8x128xf32, #tpu.memory_space<vmem>>, vector<8x128xf32>,
    return
  }
  func.func @transform_0(%arg0: i32) -> (i32, i32) {
    %c0_i32 = arith.constant 0 : i32
    %c0_i32_0 = arith.constant 0 : i32
    return %arg0, %c0_i32 : i32, i32
  }
  func.func @transform_1(%arg0: i32) -> (i32, i32) {
    %c0_i32 = arith.constant 0 : i32
    %c0_i32_0 = arith.constant 0 : i32
    %c0_i32_1 = arith.constant 0 : i32
    return %c0_i32, %c0_i32_0 : i32, i32
  }
  func.func @transform_2(%arg0: i32) -> (i32, i32) {
    %c0_i32 = arith.constant 0 : i32
    %c0_i32_0 = arith.constant 0 : i32
    %c0_i32_1 = arith.constant 0 : i32
    return %c0_i32, %c0_i32_0 : i32, i32
  }
  func.func @transform_3(%arg0: i32) -> (i32, i32) {
    %c0_i32 = arith.constant 0 : i32
    %c0_i32_0 = arith.constant 0 : i32
    %c0_i32_1 = arith.constant 0 : i32
    return %c0_i32, %c0_i32_0 : i32, i32
  }
  func.func @transform_4(%arg0: i32) -> (i32, i32) {
    %c0_i32 = arith.constant 0 : i32
    %c0_i32_0 = arith.constant 0 : i32
    %c0_i32_1 = arith.constant 0 : i32
    return %c0_i32, %c0_i32_0 : i32, i32
  }
  func.func @transform_5(%arg0: i32) -> (i32, i32) {
    %c0_i32 = arith.constant 0 : i32
    %c0_i32_0 = arith.constant 0 : i32
    return %arg0, %c0_i32 : i32, i32
  }
}

</mosaic_0001>

<bundles_post_ra>
// kernel: shared_network_forward.1
= control target key start
LH: loop header
LB: loop body
LE: loop exit
PB: predicated region body
PF: predicated region fallthrough
CT: control target
= control target key end

     0   :  { %10 = vsyncpa [#allocation3], 0  ;;  %s323_s0 = inlined_call_operand.hbm [shape: f32[8,16], index: 0, kind: input, shape index: {}]   ;;  %s324_s1 = inlined_call_operand.hbm [shape: f32[16,128], index: 1, kind: input, shape index: {}]   ;;  %s325_s2 = inlined_call_operand.vmem [shape: f32[1,128], index: 2, kind: input, shape index: {}]   ;;  %s326_s3 = inlined_call_operand.hbm [shape: f32[128,128], index: 3, kind: input, shape index: {}]   ;;  %s327_s4 = inlined_call_operand.vmem [shape: f32[1,128], index: 4, kind: input, shape index: {}]   ;;  %s328_s5 = inlined_call_operand.hbm [shape: f32[8,128], index: 5, kind: output, shape index: {}]  }
   0x1   :  { %11 = vsyncpa [#allocation6], 0  ;;  %s28_s20 = sshll.u32 %s324_s1, 4  ;;  %s29_s20 = int_to_ptr.hbm [resolvable:$true] %s28_s20 }
   0x2   :  { %12 = vsyncpa [#allocation4], 0  ;;  %s269_s21 = smov [#allocation5]   ;;  %s18_s25 = sshll.u32 %s323_s0, 4  ;;  %s19_s25 = int_to_ptr.hbm [resolvable:$true] %s18_s25 }
   0x3   :  { %s30_s22 = sshll.u32 %s269_s21, 4  ;;  %s270_s26 = smov 128   ;;  %s31_s22 = int_to_ptr.vmem [resolvable:$true] %s30_s22 }
   0x4   :  { %s271_s27 = smov 8   ;;  %s272_s28 = smov [#allocation2]  }
   0x5   :  { %36 = dma.hbm_to_vmem [thread:$0]  %s29_s20, 256, %s31_s22, [#allocation6], %s270_s26, %s270_s26, %s271_s27  }
   0x6   :  { %s20_s29 = sshll.u32 %s272_s28, 4  ;;  %s43_s7 = sshll.u32 %s326_s3, 4  ;;  %s21_s29 = int_to_ptr.vmem [resolvable:$true] %s20_s29  ;;  %s44_s7 = int_to_ptr.hbm [resolvable:$true] %s43_s7 }
   0x7   :  { %23 = dma.hbm_to_vmem [thread:$0]  %s19_s25, 128, %s21_s29, [#allocation3]  }
   0x8   :  { %s273_s1 = smov [#allocation7]  }
   0x9   :  { %s45_s8 = sshll.u32 %s273_s1, 4  ;;  %s46_s8 = int_to_ptr.vmem [resolvable:$true] %s45_s8 }
   0xa   :  { %51 = dma.hbm_to_vmem [thread:$0]  %s44_s7, 2048, %s46_s8, [#allocation6], %s270_s26, %s270_s26, %s271_s27  }
   0xb   :  { %263 = dma.done.wait [#allocation3], 128  }
   0xc   :  { %264 = vsyncadd [#allocation3], 4294967168 }
   0xd   :  { %265 = dma.done.wait [#allocation6], 2304  }
   0xe   :  { %266 = vsyncadd [#allocation6], 4294964992  ;;  %v68_v0 = vld [vmem:[#allocation5 + $0x8] sm:$0xff]  ;;  %v67_v1 = vld [vmem:[#allocation5] sm:$0xff]  ;;  %vm73_vm0 = vcmask 130048   ;;  %s274_s11 = smov [#allocation8]  }
   0xf   :  { %91 = vmatpush.msra.mxu0 %v68_v0  ;;  %v66_v2 = vld [vmem:[#allocation2] sm:$0xff]  ;;  %v113_v3 = vld [vmem:[#allocation7 + $0x78] sm:$0xff]  ;;  %v112_v4 = vld [vmem:[#allocation7 + $0x70] sm:$0xff]  ;;  %s145_s12 = sshll.u32 %s274_s11, 4  ;;  %s147_s15 = sshll.u32 %s328_s5, 4  ;;  %s146_s12 = int_to_ptr.vmem [resolvable:$true] %s145_s12  ;;  %s148_s15 = int_to_ptr.hbm [resolvable:$true] %s147_s15 }
  0x10   :  { %118 = vmatpush.msra.mxu1 %v113_v3  ;;  %v111_v5 = vld [vmem:[#allocation7 + $0x68] sm:$0xff]  ;;  %v110_v6 = vld [vmem:[#allocation7 + $0x60] sm:$0xff]  ;;  %v109_v7 = vld [vmem:[#allocation7 + $0x58] sm:$0xff] }
  0x11   :  { %92 = vmatpush.msra.mxu0 %v67_v1  ;;  %v108_v8 = vld [vmem:[#allocation7 + $0x50] sm:$0xff]  ;;  %v107_v9 = vld [vmem:[#allocation7 + $0x48] sm:$0xff]  ;;  %v106_v10 = vld [vmem:[#allocation7 + $0x40] sm:$0xff] }
  0x12   :  { %158 = vmatmul.msk.f32.vlgmr.msra.gmra.mxu0 %vm73_vm0, %v66_v2  ;;  %119 = vmatpush.msra.mxu1 %v112_v4  ;;  %v105_v11 = vld [vmem:[#allocation7 + $0x38] sm:$0xff]  ;;  %v104_v12 = vld [vmem:[#allocation7 + $0x30] sm:$0xff]  ;;  %v103_v13 = vld [vmem:[#allocation7 + $0x28] sm:$0xff] }
  0x13   :  { %v102_v14 = vld [vmem:[#allocation7 + $0x20] sm:$0xff]  ;;  %v101_v15 = vld [vmem:[#allocation7 + $0x18] sm:$0xff]  ;;  %v100_v16 = vld [vmem:[#allocation7 + $0x10] sm:$0xff] }
  0x14   :  { %120 = vmatpush.msra.mxu1 %v111_v5  ;;  %v99_v17 = vld [vmem:[#allocation7 + $0x8] sm:$0xff]  ;;  %v98_v18 = vld [vmem:[#allocation7] sm:$0xff] }
  0x15   :  { %v165_v19 = vld [vmem:[%s325_s2] ss:$0 sm:$0xff] }
  0x16   :  { %121 = vmatpush.msra.mxu1 %v110_v6  ;;  %v166_v23 = vld [vmem:[%s327_s4] ss:$0 sm:$0xff] }
  0x18   :  { %122 = vmatpush.msra.mxu1 %v109_v7 }
  0x1a   :  { %123 = vmatpush.msra.mxu1 %v108_v8 }
  0x1c   :  { %124 = vmatpush.msra.mxu1 %v107_v9 }
  0x1e   :  { %125 = vmatpush.msra.mxu1 %v106_v10 }
  0x20   :  { %126 = vmatpush.msra.mxu1 %v105_v11 }
  0x22   :  { %127 = vmatpush.msra.mxu1 %v104_v12 }
  0x24   :  { %128 = vmatpush.msra.mxu1 %v103_v13 }
  0x26   :  { %129 = vmatpush.msra.mxu1 %v102_v14 }
  0x28   :  { %130 = vmatpush.msra.mxu1 %v101_v15 }
  0x2a   :  { %131 = vmatpush.msra.mxu1 %v100_v16 }
  0x2c   :  { %132 = vmatpush.msra.mxu1 %v99_v17 }
  0x2e   :  { %133 = vmatpush.msra.mxu1 %v98_v18 }
  0x8f   :  { %v94_v20 = vpop.f32.mrf.mxu0 }
  0x90   :  { %v95_v21 = vadd.f32 %v165_v19, %v94_v20 }
  0x92   :  { %v97_v22 = vmax.f32 %v95_v21, 0.0 }
  0x94   :  { %134 = vmatmul.f32.vlgmr.msra.gmra.mxu1 %v97_v22 }
 0x111   :  { %v135_v24 = vpop.f32.mrf.mxu1 }
 0x112   :  { %v136_v25 = vadd.f32 %v166_v23, %v135_v24 }
 0x114   :  { %v138_v26 = vmax.f32 %v136_v25, 0.0 }
 0x116   :  { %139 = vst [vmem:[#allocation8] sm:$0xff] %v138_v26 }
 0x117   :  { %150 = dma.vmem_to_hbm [thread:$0]  %s146_s12, 128, %s148_s15, [#allocation4]  }
 0x118   :  { %267 = dma.done.wait [#allocation4], 128  }
 0x119   :  { %268 = vsyncadd [#allocation4], 4294967168 }
 0x11a   :  { %155 = vsyncpa [#allocation3], 1 }
 0x11b   :  { %156 = vsyncpa [#allocation6], 1 }
 0x11c   :  { %157 = vsyncpa [#allocation4], 1 }

// kernel: shared_network_forward.1
= control target key start
LH: loop header
LB: loop body
LE: loop exit
PB: predicated region body
PF: predicated region fallthrough
CT: control target
= control target key end

     0   :  { %10 = vsyncpa [#allocation3], 0  ;;  %s323_s0 = inlined_call_operand.hbm [shape: f32[8,16], index: 0, kind: input, shape index: {}]   ;;  %s324_s1 = inlined_call_operand.hbm [shape: f32[16,128], index: 1, kind: input, shape index: {}]   ;;  %s325_s2 = inlined_call_operand.vmem [shape: f32[1,128], index: 2, kind: input, shape index: {}]   ;;  %s326_s3 = inlined_call_operand.hbm [shape: f32[128,128], index: 3, kind: input, shape index: {}]   ;;  %s327_s4 = inlined_call_operand.vmem [shape: f32[1,128], index: 4, kind: input, shape index: {}]   ;;  %s328_s5 = inlined_call_operand.hbm [shape: f32[8,128], index: 5, kind: output, shape index: {}]  }
   0x1   :  { %11 = vsyncpa [#allocation6], 0  ;;  %s28_s20 = sshll.u32 %s324_s1, 4  ;;  %s29_s20 = int_to_ptr.hbm [resolvable:$true] %s28_s20 }
   0x2   :  { %12 = vsyncpa [#allocation4], 0  ;;  %s269_s21 = smov [#allocation5]   ;;  %s18_s25 = sshll.u32 %s323_s0, 4  ;;  %s19_s25 = int_to_ptr.hbm [resolvable:$true] %s18_s25 }
   0x3   :  { %s30_s22 = sshll.u32 %s269_s21, 4  ;;  %s270_s26 = smov 128   ;;  %s31_s22 = int_to_ptr.vmem [resolvable:$true] %s30_s22 }
   0x4   :  { %s271_s27 = smov 8   ;;  %s272_s28 = smov [#allocation2]  }
   0x5   :  { %36 = dma.hbm_to_vmem [thread:$0]  %s29_s20, 256, %s31_s22, [#allocation6], %s270_s26, %s270_s26, %s271_s27  }
   0x6   :  { %s20_s29 = sshll.u32 %s272_s28, 4  ;;  %s43_s7 = sshll.u32 %s326_s3, 4  ;;  %s21_s29 = int_to_ptr.vmem [resolvable:$true] %s20_s29  ;;  %s44_s7 = int_to_ptr.hbm [resolvable:$true] %s43_s7 }
   0x7   :  { %23 = dma.hbm_to_vmem [thread:$0]  %s19_s25, 128, %s21_s29, [#allocation3]  }
   0x8   :  { %s273_s1 = smov [#allocation7]  }
   0x9   :  { %s45_s8 = sshll.u32 %s273_s1, 4  ;;  %s46_s8 = int_to_ptr.vmem [resolvable:$true] %s45_s8 }
   0xa   :  { %51 = dma.hbm_to_vmem [thread:$0]  %s44_s7, 2048, %s46_s8, [#allocation6], %s270_s26, %s270_s26, %s271_s27  }
   0xb   :  { %263 = dma.done.wait [#allocation3], 128  }
   0xc   :  { %264 = vsyncadd [#allocation3], 4294967168 }
   0xd   :  { %265 = dma.done.wait [#allocation6], 2304  }
   0xe   :  { %266 = vsyncadd [#allocation6], 4294964992  ;;  %v68_v0 = vld [vmem:[#allocation5 + $0x8] sm:$0xff]  ;;  %v67_v1 = vld [vmem:[#allocation5] sm:$0xff]  ;;  %vm73_vm0 = vcmask 130048   ;;  %s274_s11 = smov [#allocation8]  }
   0xf   :  { %91 = vmatpush.msra.mxu0 %v68_v0  ;;  %v66_v2 = vld [vmem:[#allocation2] sm:$0xff]  ;;  %v113_v3 = vld [vmem:[#allocation7 + $0x78] sm:$0xff]  ;;  %v112_v4 = vld [vmem:[#allocation7 + $0x70] sm:$0xff]  ;;  %s145_s12 = sshll.u32 %s274_s11, 4  ;;  %s147_s15 = sshll.u32 %s328_s5, 4  ;;  %s146_s12 = int_to_ptr.vmem [resolvable:$true] %s145_s12  ;;  %s148_s15 = int_to_ptr.hbm [resolvable:$true] %s147_s15 }
  0x10   :  { %118 = vmatpush.msra.mxu1 %v113_v3  ;;  %v111_v5 = vld [vmem:[#allocation7 + $0x68] sm:$0xff]  ;;  %v110_v6 = vld [vmem:[#allocation7 + $0x60] sm:$0xff]  ;;  %v109_v7 = vld [vmem:[#allocation7 + $0x58] sm:$0xff] }
  0x11   :  { %92 = vmatpush.msra.mxu0 %v67_v1  ;;  %v108_v8 = vld [vmem:[#allocation7 + $0x50] sm:$0xff]  ;;  %v107_v9 = vld [vmem:[#allocation7 + $0x48] sm:$0xff]  ;;  %v106_v10 = vld [vmem:[#allocation7 + $0x40] sm:$0xff] }
  0x12   :  { %158 = vmatmul.msk.f32.vlgmr.msra.gmra.mxu0 %vm73_vm0, %v66_v2  ;;  %119 = vmatpush.msra.mxu1 %v112_v4  ;;  %v105_v11 = vld [vmem:[#allocation7 + $0x38] sm:$0xff]  ;;  %v104_v12 = vld [vmem:[#allocation7 + $0x30] sm:$0xff]  ;;  %v103_v13 = vld [vmem:[#allocation7 + $0x28] sm:$0xff] }
  0x13   :  { %v102_v14 = vld [vmem:[#allocation7 + $0x20] sm:$0xff]  ;;  %v101_v15 = vld [vmem:[#allocation7 + $0x18] sm:$0xff]  ;;  %v100_v16 = vld [vmem:[#allocation7 + $0x10] sm:$0xff] }
  0x14   :  { %120 = vmatpush.msra.mxu1 %v111_v5  ;;  %v99_v17 = vld [vmem:[#allocation7 + $0x8] sm:$0xff]  ;;  %v98_v18 = vld [vmem:[#allocation7] sm:$0xff] }
  0x15   :  { %v165_v19 = vld [vmem:[%s325_s2] ss:$0 sm:$0xff] }
  0x16   :  { %121 = vmatpush.msra.mxu1 %v110_v6  ;;  %v166_v23 = vld [vmem:[%s327_s4] ss:$0 sm:$0xff] }
  0x18   :  { %122 = vmatpush.msra.mxu1 %v109_v7 }
  0x1a   :  { %123 = vmatpush.msra.mxu1 %v108_v8 }
  0x1c   :  { %124 = vmatpush.msra.mxu1 %v107_v9 }
  0x1e   :  { %125 = vmatpush.msra.mxu1 %v106_v10 }
  0x20   :  { %126 = vmatpush.msra.mxu1 %v105_v11 }
  0x22   :  { %127 = vmatpush.msra.mxu1 %v104_v12 }
  0x24   :  { %128 = vmatpush.msra.mxu1 %v103_v13 }
  0x26   :  { %129 = vmatpush.msra.mxu1 %v102_v14 }
  0x28   :  { %130 = vmatpush.msra.mxu1 %v101_v15 }
  0x2a   :  { %131 = vmatpush.msra.mxu1 %v100_v16 }
  0x2c   :  { %132 = vmatpush.msra.mxu1 %v99_v17 }
  0x2e   :  { %133 = vmatpush.msra.mxu1 %v98_v18 }
  0x8f   :  { %v94_v20 = vpop.f32.mrf.mxu0 }
  0x90   :  { %v95_v21 = vadd.f32 %v165_v19, %v94_v20 }
  0x92   :  { %v97_v22 = vmax.f32 %v95_v21, 0.0 }
  0x94   :  { %134 = vmatmul.f32.vlgmr.msra.gmra.mxu1 %v97_v22 }
 0x111   :  { %v135_v24 = vpop.f32.mrf.mxu1 }
 0x112   :  { %v136_v25 = vadd.f32 %v166_v23, %v135_v24 }
 0x114   :  { %v138_v26 = vmax.f32 %v136_v25, 0.0 }
 0x116   :  { %139 = vst [vmem:[#allocation8] sm:$0xff] %v138_v26 }
 0x117   :  { %150 = dma.vmem_to_hbm [thread:$0]  %s146_s12, 128, %s148_s15, [#allocation4]  }
 0x118   :  { %267 = dma.done.wait [#allocation4], 128  }
 0x119   :  { %268 = vsyncadd [#allocation4], 4294967168 }
 0x11a   :  { %155 = vsyncpa [#allocation3], 1 }
 0x11b   :  { %156 = vsyncpa [#allocation6], 1 }
 0x11c   :  { %157 = vsyncpa [#allocation4], 1 }

</bundles_post_ra>
